<compile_context>
chip_gen: v5e
topology: v5e:2x2
jax: 0.10.0
libtpu: 0.0.40
codegen_flags: <defaults>
</compile_context>

<pallas_src>
import functools

import jax
import jax.numpy as jnp
from jax.experimental import pallas as pl
from jax.experimental.pallas import tpu as pltpu


# ---------------------------------------------------------------------------
# Module-semantics helpers
# ---------------------------------------------------------------------------

def _adjust_groups(c, groups):
    """Same adjustment rule as the PyTorch module."""
    if c % groups != 0:
        groups = min(c, groups)
        if c % groups != 0:
            raise ValueError(
                f"Number of channels ({c}) must be divisible by the number of "
                f"groups ({groups}) after adjustment")
    return groups


# ---------------------------------------------------------------------------
# Per-chip configuration (VMEM budget, block targets, TensorCore count)
# ---------------------------------------------------------------------------

def _chip_config():
    vmem_phys = None
    try:
        vmem_phys = int(pltpu.get_tpu_info().vmem_capacity_bytes)
    except Exception:
        vmem_phys = None
    kind = ""
    try:
        kind = jax.devices()[0].device_kind.lower()
    except Exception:
        kind = ""
    if vmem_phys is None:
        vmem_phys = (64 << 20) if "v7" in kind else (128 << 20)

    small_vmem = (vmem_phys <= (64 << 20)) or ("v7" in kind)
    if small_vmem:
        # v7x-like: 64 MiB VMEM per TensorCore, 2 TCs, 3.2 TB/s HBM.
        cfg = dict(vmem_cap=52 << 20, usable=44 << 20,
                   target_block=6 << 20, n_cores=2)
    else:
        # v5e / v6e: 128 MiB VMEM, single TensorCore.
        cfg = dict(vmem_cap=104 << 20, usable=88 << 20,
                   target_block=10 << 20, n_cores=1)
    # Never request more than physical VMEM minus headroom for compiler scratch.
    cfg["vmem_cap"] = min(cfg["vmem_cap"], max(vmem_phys - (8 << 20), 16 << 20))
    cfg["usable"] = max(min(cfg["usable"], cfg["vmem_cap"] - (4 << 20)), 8 << 20)
    return cfg


# ---------------------------------------------------------------------------
# Block-size selection
# ---------------------------------------------------------------------------

def _pick_tn(n, slab_bytes, slab_f32_bytes, target_bytes, usable_vmem, n_cores):
    """Batch-axis tile for the single-pass kernel; None if a slab cannot fit."""
    # 2 input + 2 output pipeline buffers per slab + f32 temporaries (cast/product).
    per_tn = 4 * slab_bytes + 2 * slab_f32_bytes
    budget = usable_vmem - (2 << 20)
    if per_tn > budget:
        return None
    cap = n
    if n_cores > 1 and n >= 2:
        cap = (n + 1) // 2          # keep >=2 grid steps so both TCs get work (v7x)
    tn = min(cap, max(1, target_bytes // max(slab_bytes, 1)), budget // per_tn)
    return max(1, int(tn))


def _pick_thw(hw, cg, itemsize, target_bytes, usable_vmem):
    """HW-axis chunk (multiple of 128) for the two-pass kernels."""
    per_lane = cg * (4 * itemsize + 2 * 4)      # pipeline buffers + f32 temps per hw elem
    budget = usable_vmem - (2 << 20)
    thw = min(budget // per_lane, max(1, target_bytes // (cg * itemsize)))
    thw = max(128, (thw // 128) * 128)
    if thw >= hw:
        thw = hw
    return int(thw)


# ---------------------------------------------------------------------------
# In-kernel channel conv (Conv1d(1,1,k, 'same' padding)) + sigmoid
# ---------------------------------------------------------------------------

def _conv_sigmoid(y, wb_ref, k):
    """y: (TN, Cg, 1) f32.  wb_ref: SMEM (k+1,) = [w_0 .. w_{k-1}, bias]."""
    tn, cg, _ = y.shape
    p = (k - 1) // 2
    if p > 0:
        zpad = jnp.zeros((tn, p, 1), jnp.float32)
        ypad = jnp.concatenate([zpad, y, zpad], axis=1)       # zero 'same' padding
    else:
        ypad = y
    yc = jnp.zeros((tn, cg, 1), jnp.float32) + wb_ref[k]      # bias
    for j in range(k):                                        # k is small; unrolled
        yc = yc + wb_ref[j] * ypad[:, j:j + cg, :]            # shifted tap
    return jax.nn.sigmoid(yc)


# ---------------------------------------------------------------------------
# Kernels
# ---------------------------------------------------------------------------

def _emca_kernel(hw, k, x_ref, wb_ref, o_ref):
    """Single-pass: whole (Cg, HW) slab resident per batch*group row."""
    xf = x_ref[...].astype(jnp.float32)                       # (TN, Cg, HW)
    y = (jnp.sum(xf, axis=-1, keepdims=True) * (1.0 / hw)
         + jnp.max(xf, axis=-1, keepdims=True))               # avg-pool + max-pool
    scale = _conv_sigmoid(y, wb_ref, k)                       # (TN, Cg, 1) f32
    # Multiply/store in the input dtype (bf16 stays bf16; f32 path unchanged).
    o_ref[...] = x_ref[...] * scale.astype(o_ref.dtype)


def _emca_reduce_kernel(hw, k, x_ref, wb_ref, scale_ref, sum_ref, max_ref):
    """Two-pass, pass 1: accumulate sum/max over HW chunks, then conv+sigmoid."""
    j = pl.program_id(1)

    @pl.when(j == 0)
    def _():
        sum_ref[...] = jnp.zeros_like(sum_ref)
        max_ref[...] = jnp.full_like(max_ref, -jnp.inf)

    tn, cg, thw = x_ref.shape
    xf = x_ref[...].astype(jnp.float32)
    lane = jax.lax.broadcasted_iota(jnp.int32, (tn, cg, thw), 2)
    valid = (j * thw + lane) < hw                              # mask padded lanes
    sum_ref[...] += jnp.sum(jnp.where(valid, xf, 0.0), axis=-1, keepdims=True)
    max_ref[...] = jnp.maximum(
        max_ref[...],
        jnp.max(jnp.where(valid, xf, -jnp.inf), axis=-1, keepdims=True))

    @pl.when(j == pl.num_programs(1) - 1)
    def _():
        y = sum_ref[...] * (1.0 / hw) + max_ref[...]
        scale_ref[...] = _conv_sigmoid(y, wb_ref, k)


def _emca_scale_kernel(x_ref, scale_ref, o_ref):
    """Two-pass, pass 2: apply the per-channel scale to HW chunks."""
    o_ref[...] = x_ref[...] * scale_ref[...].astype(o_ref.dtype)


# ---------------------------------------------------------------------------
# Wrapper
# ---------------------------------------------------------------------------

def emca_forward(x, conv_w, conv_b, groups, *, target_block_bytes=None,
                 two_pass=None):
    """EMCA forward.  x: (B, C, H, W).  conv_w: (1, 1, k).  conv_b: (1,)."""
    b, c, h, w = x.shape
    groups = _adjust_groups(c, groups)
    cg = c // groups
    n = b * groups
    hw = h * w

    k = int(conv_w.shape[-1])
    if k % 2 != 1:
        raise ValueError("EMCA kernel_size must be odd (Conv1d 'same' padding)")

    cfg = _chip_config()
    if target_block_bytes is None:
        target_block_bytes = cfg["target_block"]

    xg = x.reshape(n, cg, hw)                      # contiguous reshape (pure view)
    wb = jnp.concatenate(
        [conv_w.reshape(-1), conv_b.reshape(-1)]).astype(jnp.float32)

    itemsize = jnp.dtype(x.dtype).itemsize
    slab_bytes = cg * hw * itemsize
    slab_f32_bytes = cg * hw * 4

    tn = _pick_tn(n, slab_bytes, slab_f32_bytes, target_block_bytes,
                  cfg["usable"], cfg["n_cores"])
    use_two_pass = (tn is None) if two_pass is None else bool(two_pass)

    if not use_two_pass:
        grid_n = pl.cdiv(n, tn)
        vmem_need = tn * (4 * slab_bytes + 2 * slab_f32_bytes) + (2 << 20)
        vmem_limit = int(min(max(vmem_need, 32 << 20), cfg["vmem_cap"]))
        out = pl.pallas_call(
            functools.partial(_emca_kernel, hw, k),
            out_shape=jax.ShapeDtypeStruct((n, cg, hw), x.dtype),
            grid=(grid_n,),
            in_specs=[
                pl.BlockSpec((tn, cg, hw), lambda i: (i, 0, 0)),       # x slabs
                pl.BlockSpec(memory_space=pltpu.MemorySpace.SMEM),     # weights+bias
            ],
            out_specs=pl.BlockSpec((tn, cg, hw), lambda i: (i, 0, 0)),
            compiler_params=pltpu.CompilerParams(
                dimension_semantics=("parallel",),
                vmem_limit_bytes=vmem_limit),
        )(xg, wb)
        return out.reshape(b, c, h, w)

    # ---- two-pass reduce-then-scale (slab too large to keep resident) ----
    thw = _pick_thw(hw, cg, itemsize, target_block_bytes, cfg["usable"])
    grid_hw = pl.cdiv(hw, thw)
    blk_bytes = cg * thw * itemsize
    blk_f32_bytes = cg * thw * 4
    vmem_need = 4 * blk_bytes + 2 * blk_f32_bytes + (2 << 20)
    vmem_limit = int(min(max(vmem_need, 32 << 20), cfg["vmem_cap"]))

    scale = pl.pallas_call(
        functools.partial(_emca_reduce_kernel, hw, k),
        out_shape=jax.ShapeDtypeStruct((n, cg, 1), jnp.float32),
        grid=(n, grid_hw),
        in_specs=[
            pl.BlockSpec((1, cg, thw), lambda i, j: (i, 0, j)),
            pl.BlockSpec(memory_space=pltpu.MemorySpace.SMEM),
        ],
        out_specs=pl.BlockSpec((1, cg, 1), lambda i, j: (i, 0, 0)),
        scratch_shapes=[pltpu.VMEM((1, cg, 1), jnp.float32),
                        pltpu.VMEM((1, cg, 1), jnp.float32)],
        compiler_params=pltpu.CompilerParams(
            dimension_semantics=("parallel", "arbitrary"),
            vmem_limit_bytes=vmem_limit),
    )(xg, wb)

    out = pl.pallas_call(
        _emca_scale_kernel,
        out_shape=jax.ShapeDtypeStruct((n, cg, hw), x.dtype),
        grid=(n, grid_hw),
        in_specs=[
            pl.BlockSpec((1, cg, thw), lambda i, j: (i, 0, j)),
            pl.BlockSpec((1, cg, 1), lambda i, j: (i, 0, 0)),
        ],
        out_specs=pl.BlockSpec((1, cg, thw), lambda i, j: (i, 0, j)),
        compiler_params=pltpu.CompilerParams(
            dimension_semantics=("parallel", "parallel"),
            vmem_limit_bytes=vmem_limit),
    )(xg, scale)
    return out.reshape(b, c, h, w)


# ---------------------------------------------------------------------------
# Pure-JAX reference of the PyTorch forward (for verification)
# ---------------------------------------------------------------------------

def emca_reference(x, conv_w, conv_b, groups):
    b, c, h, w = x.shape
    groups = _adjust_groups(c, groups)
    cg = c // groups
    xg = x.astype(jnp.float32).reshape(b * groups, cg, h * w)
    y = jnp.mean(xg, axis=-1) + jnp.max(xg, axis=-1)           # (N, Cg)
    k = conv_w.shape[-1]
    p = (k - 1) // 2
    yp = jnp.pad(y, ((0, 0), (p, p)))
    wk = conv_w.reshape(-1).astype(jnp.float32)
    yc = sum(wk[t] * yp[:, t:t + cg] for t in range(k)) + conv_b[0]
    s = jax.nn.sigmoid(yc)
    out = xg * s[:, :, None]
    return out.reshape(b, c, h, w)


if __name__ == "__main__":
    key = jax.random.PRNGKey(0)
    kx, kw, kb = jax.random.split(key, 3)

    # Deterministic synthetic Conv1d(1, 1, 3) parameters (no checkpoint load).
    conv_w = jax.random.normal(kw, (1, 1, 3), dtype=jnp.float32) * 0.5
    conv_b = jax.random.normal(kb, (1,), dtype=jnp.float32) * 0.1

    # 1) Primary: f32, HW a multiple of 128 (lane-dense single-pass path).
    x1 = jax.random.normal(kx, (2, 8, 16, 16), dtype=jnp.float32)
    o1 = emca_forward(x1, conv_w, conv_b, groups=2)
    jax.block_until_ready(o1)
    r1 = emca_reference(x1, conv_w, conv_b, groups=2)
    assert o1.shape == x1.shape
    assert jnp.allclose(o1, r1, atol=1e-5, rtol=1e-5), "mismatch (f32 path)"

    # 2) bf16 input, HW not a multiple of 128 (masked-lane single-pass path).
    x2 = jax.random.normal(kx, (2, 8, 7, 7), dtype=jnp.float32).astype(jnp.bfloat16)
    o2 = emca_forward(x2, conv_w, conv_b, groups=2)
    jax.block_until_ready(o2)
    r2 = emca_reference(x2, conv_w, conv_b, groups=2)
    assert jnp.allclose(o2.astype(jnp.float32), r2, atol=3e-2, rtol=3e-2), \
        "mismatch (bf16 path)"

    # 3) Batch-axis remainder: tile does not divide N (masked last block).
    x3 = jax.random.normal(kx, (5, 4, 8, 8), dtype=jnp.float32)
    slab3 = 4 * 64 * 4
    o3 = emca_forward(x3, conv_w, conv_b, groups=1, target_block_bytes=2 * slab3)
    jax.block_until_ready(o3)
    r3 = emca_reference(x3, conv_w, conv_b, groups=1)
    assert jnp.allclose(o3, r3, atol=1e-5, rtol=1e-5), "mismatch (remainder path)"

    # 4) Forced two-pass reduce-then-scale path (large-slab / v7x fallback).
    x4 = jax.random.normal(kx, (2, 8, 12, 16), dtype=jnp.float32)
    o4 = emca_forward(x4, conv_w, conv_b, groups=2,
                      target_block_bytes=2048, two_pass=True)
    jax.block_until_ready(o4)
    r4 = emca_reference(x4, conv_w, conv_b, groups=2)
    assert jnp.allclose(o4, r4, atol=1e-5, rtol=1e-5), "mismatch (two-pass path)"

    print("KERNEL_OK")
</pallas_src>

<mosaic_0001>
module attributes {stable_mosaic.version = 11 : i64} {
  func.func @_emca_kernel(%arg0: i32, %arg1: memref<4x4x256xf32, #tpu.memory_space<vmem>>, %arg2: memref<4xf32, #tpu.memory_space<smem>>, %arg3: memref<4x4x256xf32, #tpu.memory_space<vmem>>) attributes {dimension_semantics = [#tpu.dimension_semantics<parallel>], iteration_bounds = array<i64: 1>, scalar_prefetch = 0 : i64, scratch_operands = 0 : i64, tpu.core_type = #tpu.core_type<tc>, window_params = [{transform_indices = @transform_0, window_bounds = array<i64: 4, 4, 256>}, {transform_indices = @transform_1, window_bounds = array<i64: 4>}, {transform_indices = @transform_2, window_bounds = array<i64: 4, 4, 256>}]} {
    %c0 = arith.constant 0 : index
    %c0_0 = arith.constant 0 : index
    %c0_1 = arith.constant 0 : index
    %0 = vector.load %arg1[%c0, %c0_0, %c0_1] : memref<4x4x256xf32, #tpu.memory_space<vmem>>, vector<4x4x256xf32>
    %cst = arith.constant dense<0.000000e+00> : vector<4x4xf32>
    %1 = vector.multi_reduction <add>, %0, %cst [2] : vector<4x4x256xf32> to vector<4x4xf32>
    %2 = vector.shape_cast %1 : vector<4x4xf32> to vector<4x4x1xf32>
    %cst_2 = arith.constant 3.906250e-03 : f32
    %3 = vector.broadcast %cst_2 : f32 to vector<4x4x1xf32>
    %4 = arith.mulf %2, %3 : vector<4x4x1xf32>
    %cst_3 = arith.constant dense<0xFF800000> : vector<4x4xf32>
    %5 = vector.multi_reduction <maximumf>, %0, %cst_3 [2] : vector<4x4x256xf32> to vector<4x4xf32>
    %6 = vector.shape_cast %5 : vector<4x4xf32> to vector<4x4x1xf32>
    %7 = arith.addf %4, %6 : vector<4x4x1xf32>
    %cst_4 = arith.constant 0.000000e+00 : f32
    %8 = vector.broadcast %cst_4 : f32 to vector<4x1x1xf32>
    %9 = tpu.concatenate %8, %7, %8 in 1 : vector<4x1x1xf32>, vector<4x4x1xf32>, vector<4x1x1xf32> -> vector<4x6x1xf32>
    %cst_5 = arith.constant 0.000000e+00 : f32
    %10 = vector.broadcast %cst_5 : f32 to vector<4x4x1xf32>
    %c3 = arith.constant 3 : index
    %11 = memref.load %arg2[%c3] : memref<4xf32, #tpu.memory_space<smem>>
    %12 = vector.broadcast %11 : f32 to vector<4x4x1xf32>
    %13 = arith.addf %10, %12 : vector<4x4x1xf32>
    %c0_6 = arith.constant 0 : index
    %14 = memref.load %arg2[%c0_6] : memref<4xf32, #tpu.memory_space<smem>>
    %15 = vector.extract_strided_slice %9 {offsets = [0, 0, 0], sizes = [4, 4, 1], strides = [1, 1, 1]} : vector<4x6x1xf32> to vector<4x4x1xf32>
    %16 = vector.broadcast %14 : f32 to vector<4x4x1xf32>
    %17 = arith.mulf %16, %15 : vector<4x4x1xf32>
    %18 = arith.addf %13, %17 : vector<4x4x1xf32>
    %c1 = arith.constant 1 : index
    %19 = memref.load %arg2[%c1] : memref<4xf32, #tpu.memory_space<smem>>
    %20 = vector.extract_strided_slice %9 {offsets = [0, 1, 0], sizes = [4, 4, 1], strides = [1, 1, 1]} : vector<4x6x1xf32> to vector<4x4x1xf32>
    %21 = vector.broadcast %19 : f32 to vector<4x4x1xf32>
    %22 = arith.mulf %21, %20 : vector<4x4x1xf32>
    %23 = arith.addf %18, %22 : vector<4x4x1xf32>
    %c2 = arith.constant 2 : index
    %24 = memref.load %arg2[%c2] : memref<4xf32, #tpu.memory_space<smem>>
    %25 = vector.extract_strided_slice %9 {offsets = [0, 2, 0], sizes = [4, 4, 1], strides = [1, 1, 1]} : vector<4x6x1xf32> to vector<4x4x1xf32>
    %26 = vector.broadcast %24 : f32 to vector<4x4x1xf32>
    %27 = arith.mulf %26, %25 : vector<4x4x1xf32>
    %28 = arith.addf %23, %27 : vector<4x4x1xf32>
    %29 = arith.negf %28 : vector<4x4x1xf32>
    %30 = math.exp %29 : vector<4x4x1xf32>
    %cst_7 = arith.constant 1.000000e+00 : f32
    %31 = vector.broadcast %cst_7 : f32 to vector<4x4x1xf32>
    %32 = arith.addf %31, %30 : vector<4x4x1xf32>
    %33 = arith.divf %31, %32 : vector<4x4x1xf32>
    %c0_8 = arith.constant 0 : index
    %c0_9 = arith.constant 0 : index
    %c0_10 = arith.constant 0 : index
    %34 = vector.load %arg1[%c0_8, %c0_9, %c0_10] : memref<4x4x256xf32, #tpu.memory_space<vmem>>, vector<4x4x256xf32>
    %35 = vector.broadcast %33 : vector<4x4x1xf32> to vector<4x4x256xf32>
    %36 = arith.mulf %34, %35 : vector<4x4x256xf32>
    %c0_11 = arith.constant 0 : index
    %c0_12 = arith.constant 0 : index
    %c0_13 = arith.constant 0 : index
    %37 = vector.load %arg3[%c0_11, %c0_12, %c0_13] : memref<4x4x256xf32, #tpu.memory_space<vmem>>, vector<4x4x256xf32>
    tpu.vector_store %arg3[%c0_11, %c0_12, %c0_13], %36 {strides = array<i32>} : memref<4x4x256xf32, #tpu.memory_space<vmem>>, vector<4x4x256xf32>,
    return
  }
  func.func @transform_0(%arg0: i32) -> (i32, i32, i32) {
    %c0_i32 = arith.constant 0 : i32
    %c0_i32_0 = arith.constant 0 : i32
    %c0_i32_1 = arith.constant 0 : i32
    return %arg0, %c0_i32, %c0_i32_0 : i32, i32, i32
  }
  func.func @transform_1(%arg0: i32) -> i32 {
    %c0_i32 = arith.constant 0 : i32
    %c0_i32_0 = arith.constant 0 : i32
    return %c0_i32 : i32
  }
  func.func @transform_2(%arg0: i32) -> (i32, i32, i32) {
    %c0_i32 = arith.constant 0 : i32
    %c0_i32_0 = arith.constant 0 : i32
    %c0_i32_1 = arith.constant 0 : i32
    return %arg0, %c0_i32, %c0_i32_0 : i32, i32, i32
  }
}

</mosaic_0001>

<bundles_post_ra>
// kernel: tpu_custom_call.1
= control target key start
LH: loop header
LB: loop body
LE: loop exit
PB: predicated region body
PF: predicated region fallthrough
CT: control target
= control target key end

     0   :  { %7 = vsyncpa [#allocation3], 0  ;;  %s545_s0 = inlined_call_operand.hbm [shape: f32[4,4,256], index: 0, kind: input, shape index: {}]   ;;  %s546_s1 = inlined_call_operand.hbm [shape: f32[4], index: 1, kind: input, shape index: {}]   ;;  %s547_s2 = inlined_call_operand.hbm [shape: f32[4,4,256], index: 2, kind: output, shape index: {}]  }
   0x1   :  { %8 = vsyncpa [#allocation5], 0 }
   0x2   :  { %9 = vsyncpa [#allocation4], 0  ;;  %s14_s11 = sshll.u32 %s545_s0, 4  ;;  %s462_s12 = smov [#allocation2]   ;;  %s15_s11 = int_to_ptr.hbm [resolvable:$true] %s14_s11 }
   0x3   :  { %s16_s13 = sshll.u32 %s462_s12, 4  ;;  %s28_s16 = sshll.u32 %s546_s1, 4  ;;  %s17_s13 = int_to_ptr.vmem [resolvable:$true] %s16_s13  ;;  %s29_s16 = int_to_ptr.hbm [resolvable:$true] %s28_s16 }
   0x4   :  { %s463_s17 = smov 128   ;;  %s464_s18 = smov 8  }
   0x5   :  { %22 = dma.hbm_to_vmem [thread:$0]  %s15_s11, 512, %s17_s13, [#allocation3], %s463_s17, %s463_s17, %s464_s18  }
   0x6   :  { %s465_s19 = smov [#allocation6]  }
   0x7   :  { %31 = dma.hbm_to_smem %s29_s16, 16, %s465_s19, [#allocation5]  }
   0x8   :  { %456 = dma.done.wait [#allocation3], 512  }
   0x9   :  { %457 = vsyncadd [#allocation3], 4294966784 }
   0xa   :  { %458 = dma.done.wait [#allocation5], 16  }
   0xb   :  { %459 = vsyncadd [#allocation5], 4294967280 }
   0xc   :  { %40 = sfence }
   0xd   :  { %v493_v0 = vld [vmem:[#allocation2] sm:$0xff]  ;;  %v495_v1 = vld [vmem:[#allocation2 + $0x10] sm:$0xff]  ;;  %v497_v2 = vld [vmem:[#allocation2 + $0x8] sm:$0xff]  ;;  %vm72_vm0 = vcmask 1043456   ;;  %s169_s0 = sld [smem:[#allocation6]]  ;;  %vm156_vm1 = vcmask 1040384  }
   0xe   :  { %49 = vst [vmem:[#allocation1] ss:$2 sm:$0xff] %v493_v0  ;;  %v500_v3 = vld [vmem:[#allocation2 + $0x18] sm:$0xff]  ;;  %s364_s1 = sld [smem:[#allocation6 + $0x1]]  ;;  %vm161_vm2 = vcmask 1044480   ;;  %s468_s22 = smov [#allocation7]  }
   0xf   :  { %57 = vst [vmem:[#allocation1 + $0x20] ss:$2 sm:$0xff] %v495_v1  ;;  %s365_s20 = sld [smem:[#allocation6 + $0x2]]  ;;  %s347_s23 = sshll.u32 %s468_s22, 4  ;;  %s348_s23 = int_to_ptr.vmem [resolvable:$true] %s347_s23 }
  0x10   :  { %53 = vst [vmem:[#allocation1 + $0x10] ss:$2 sm:$0xff] %v497_v2  ;;  %s363_s21 = sld [smem:[#allocation6 + $0x3]]  ;;  %s349_s26 = sshll.u32 %s547_s2, 4  ;;  %s350_s26 = int_to_ptr.hbm [resolvable:$true] %s349_s26 }
  0x11   :  { %61 = vst [vmem:[#allocation1 + $0x30] ss:$2 sm:$0xff] %v500_v3 }
  0x13   :  { %v170_v52 = vstv %s169_s0 }
  0x14   :  { %v180_v53 = vstv %s364_s1 }
  0x15   :  { %v50_v4 = vld.sshfl [vmem:[#allocation1] sm:$0xff pattern:$0x75316420]  ;;  %v51_v5 = vld.sshfl [vmem:[#allocation1 + $0x8] sm:$0xff pattern:$0x75316420]  ;;  %v202_v54 = vstv %s365_s20 }
  0x16   :  { %v73_v6 = vsel %vm72_vm0, %v50_v4, 0.0  ;;  %v74_v7 = vsel %vm72_vm0, %v51_v5, 0.0  ;;  %97 = vst [vmem:[#allocation1] ss:$2 sm:$0xff] %v493_v0  ;;  %v167_v55 = vstv %s363_s21  ;;  %v466_v4 = vmov 0  }
  0x17   :  { %v75_v8 = vadd.f32 %v74_v7, %v73_v6  ;;  %v58_v9 = vld.sshfl [vmem:[#allocation1 + $0x20] sm:$0xff pattern:$0x75316420]  ;;  %v59_v10 = vld.sshfl [vmem:[#allocation1 + $0x28] sm:$0xff pattern:$0x75316420]  ;;  %377 = vset.pattern.permute.xlu2 %v466_v4  ;;  %379 = vset.pattern.permute.xlu1 %v466_v4 }
  0x18   :  { %v83_v11 = vsel %vm72_vm0, %v58_v9, 0.0  ;;  %v84_v12 = vsel %vm72_vm0, %v59_v10, 0.0  ;;  %105 = vst [vmem:[#allocation1 + $0x20] ss:$2 sm:$0xff] %v495_v1  ;;  %378 = vset.pattern.permute.xlu0 %v466_v4 }
  0x19   :  { %76 = vadd.xlane.f32.xlu0 %v75_v8  ;;  %v85_v13 = vadd.f32 %v84_v12, %v83_v11  ;;  %v54_v14 = vld.sshfl [vmem:[#allocation1 + $0x10] sm:$0xff pattern:$0x75316420]  ;;  %v55_v15 = vld.sshfl [vmem:[#allocation1 + $0x18] sm:$0xff pattern:$0x75316420] }
  0x1a   :  { %v78_v16 = vsel %vm72_vm0, %v54_v14, 0.0  ;;  %v79_v17 = vsel %vm72_vm0, %v55_v15, 0.0  ;;  %101 = vst [vmem:[#allocation1 + $0x10] ss:$2 sm:$0xff] %v497_v2 }
  0x1b   :  { %86 = vadd.xlane.f32.xlu1 %v85_v13  ;;  %v62_v18 = vld.sshfl [vmem:[#allocation1 + $0x30] sm:$0xff pattern:$0x75316420]  ;;  %v63_v19 = vld.sshfl [vmem:[#allocation1 + $0x38] sm:$0xff pattern:$0x75316420]  ;;  %v80_v24 = vadd.f32 %v79_v17, %v78_v16 }
  0x1c   :  { %v88_v20 = vsel %vm72_vm0, %v62_v18, 0.0  ;;  %v89_v21 = vsel %vm72_vm0, %v63_v19, 0.0  ;;  %109 = vst [vmem:[#allocation1 + $0x30] ss:$2 sm:$0xff] %v500_v3 }
  0x1d   :  { %v98_v22 = vld.sshfl [vmem:[#allocation1] sm:$0xff pattern:$0x75316420]  ;;  %v99_v23 = vld.sshfl [vmem:[#allocation1 + $0x8] sm:$0xff pattern:$0x75316420]  ;;  %v90_v28 = vadd.f32 %v89_v21, %v88_v20 }
  0x1e   :  { %v120_v25 = vsel %vm72_vm0, %v98_v22, -inf  ;;  %v121_v26 = vsel %vm72_vm0, %v99_v23, -inf }
  0x1f   :  { %v122_v27 = vmax.f32 %v120_v25, %v121_v26  ;;  %v106_v29 = vld.sshfl [vmem:[#allocation1 + $0x20] sm:$0xff pattern:$0x75316420]  ;;  %v107_v30 = vld.sshfl [vmem:[#allocation1 + $0x28] sm:$0xff pattern:$0x75316420] }
  0x20   :  { %v130_v35 = vsel %vm72_vm0, %v106_v29, -inf  ;;  %v131_v36 = vsel %vm72_vm0, %v107_v30, -inf }
  0x21   :  { %123 = vmax.xlane.f32.xlu2 %v122_v27  ;;  %81 = vadd.xlane.f32.xlu0 %v80_v24  ;;  %v102_v31 = vld.sshfl [vmem:[#allocation1 + $0x10] sm:$0xff pattern:$0x75316420]  ;;  %v103_v32 = vld.sshfl [vmem:[#allocation1 + $0x18] sm:$0xff pattern:$0x75316420]  ;;  %v132_v42 = vmax.f32 %v130_v35, %v131_v36 }
  0x22   :  { %v125_v33 = vsel %vm72_vm0, %v102_v31, -inf  ;;  %v126_v34 = vsel %vm72_vm0, %v103_v32, -inf }
  0x23   :  { %91 = vadd.xlane.f32.xlu1 %v90_v28  ;;  %v110_v37 = vld.sshfl [vmem:[#allocation1 + $0x30] sm:$0xff pattern:$0x75316420]  ;;  %v111_v38 = vld.sshfl [vmem:[#allocation1 + $0x38] sm:$0xff pattern:$0x75316420]  ;;  %v127_v41 = vmax.f32 %v125_v33, %v126_v34 }
  0x24   :  { %v135_v39 = vsel %vm72_vm0, %v110_v37, -inf  ;;  %v136_v40 = vsel %vm72_vm0, %v111_v38, -inf }
  0x25   :  { %v137_v43 = vmax.f32 %v135_v39, %v136_v40 }
  0x29   :  { %128 = vmax.xlane.f32.xlu2 %v127_v41  ;;  %133 = vmax.xlane.f32.xlu0 %v132_v42 }
  0x2b   :  { %138 = vmax.xlane.f32.xlu1 %v137_v43 }
  0x8c   :  { %v77_v44 = vpop.xlane.xlu0 %76 }
  0x8d   :  { %v93_v46 = vmul.f32 0.00390625, %v77_v44 }
  0x8e   :  { %v87_v45 = vpop.xlane.xlu1 %86 }
  0x8f   :  { %v95_v57 = vmul.f32 0.00390625, %v87_v45 }
  0x94   :  { %v124_v47 = vpop.xlane.xlu2 %123  ;;  %v82_v48 = vpop.xlane.xlu0 %81 }
  0x95   :  { %v140_v49 = vadd.f32 %v124_v47, %v93_v46  ;;  %v94_v59 = vmul.f32 0.00390625, %v82_v48 }
  0x96   :  { %v92_v50 = vpop.xlane.xlu1 %91 }
  0x97   :  { %v148_v51 = vrot.slane %v140_v49, 7  ;;  %v96_v63 = vmul.f32 0.00390625, %v92_v50 }
  0x99   :  { %v157_v56 = vsel %vm156_vm1, 0.0, %v148_v51 }
  0x9a   :  { %v162_v58 = vsel %vm161_vm2, %v157_v56, 0.0 }
  0x9b   :  { %v171_v60 = vmul.f32 %v170_v52, %v162_v58  ;;  %v181_v61 = vmul.f32 %v180_v53, %v162_v58  ;;  %v203_v62 = vmul.f32 %v202_v54, %v162_v58 }
  0x9c   :  { %v129_v5 = vpop.xlane.xlu2 %128  ;;  %v134_v6 = vpop.xlane.xlu0 %133 }
  0x9d   :  { %v175_v7 = vadd.f32 %v171_v60, %v167_v55  ;;  %v189_v8 = vrot.slane %v181_v61, 1  ;;  %v141_v9 = vadd.f32 %v129_v5, %v94_v59  ;;  %v142_v10 = vadd.f32 %v134_v6, %v95_v57 }
  0x9e   :  { %v139_v11 = vpop.xlane.xlu1 %138  ;;  %v211_v13 = vrot.slane %v203_v62, 2 }
  0x9f   :  { %v197_v12 = vadd.f32 %v189_v8, %v175_v7  ;;  %v149_v14 = vrot.slane %v141_v9, 7  ;;  %v143_v15 = vadd.f32 %v139_v11, %v96_v63  ;;  %v150_v16 = vrot.slane %v142_v10, 7 }
  0xa1   :  { %v219_v17 = vadd.f32 %v211_v13, %v197_v12  ;;  %v158_v18 = vsel %vm156_vm1, 0.0, %v149_v14  ;;  %v151_v19 = vrot.slane %v143_v15, 7  ;;  %v159_v21 = vsel %vm156_vm1, 0.0, %v150_v16 }
  0xa2   :  { %v163_v20 = vsel %vm161_vm2, %v158_v18, 0.0  ;;  %v164_v26 = vsel %vm161_vm2, %v159_v21, 0.0 }
  0xa3   :  { %v366_v22 = vmul.f32 -1.442695, %v219_v17  ;;  %v172_v23 = vmul.f32 %v170_v52, %v163_v20  ;;  %v182_v24 = vmul.f32 %v180_v53, %v163_v20  ;;  %v204_v25 = vmul.f32 %v202_v54, %v163_v20 }
  0xa4   :  { %v160_v27 = vsel %vm156_vm1, 0.0, %v151_v19  ;;  %v173_v31 = vmul.f32 %v170_v52, %v164_v26  ;;  %v183_v32 = vmul.f32 %v180_v53, %v164_v26  ;;  %v205_v33 = vmul.f32 %v202_v54, %v164_v26 }
  0xa5   :  { %380 = vpow2.f32 %v366_v22  ;;  %v176_v28 = vadd.f32 %v172_v23, %v167_v55  ;;  %v190_v29 = vrot.slane %v182_v24, 1  ;;  %v212_v30 = vrot.slane %v204_v25, 2 }
  0xa6   :  { %v165_v34 = vsel %vm161_vm2, %v160_v27, 0.0  ;;  %v177_v39 = vadd.f32 %v173_v31, %v167_v55  ;;  %v191_v40 = vrot.slane %v183_v32, 1  ;;  %v213_v46 = vrot.slane %v205_v33, 2 }
  0xa7   :  { %v198_v35 = vadd.f32 %v190_v29, %v176_v28  ;;  %v174_v36 = vmul.f32 %v170_v52, %v165_v34  ;;  %v184_v37 = vmul.f32 %v180_v53, %v165_v34  ;;  %v206_v38 = vmul.f32 %v202_v54, %v165_v34 }
  0xa8   :  { %v199_v45 = vadd.f32 %v191_v40, %v177_v39 }
  0xa9   :  { %v220_v41 = vadd.f32 %v212_v30, %v198_v35  ;;  %v178_v42 = vadd.f32 %v174_v36, %v167_v55  ;;  %v192_v43 = vrot.slane %v184_v37, 1  ;;  %v214_v44 = vrot.slane %v206_v38, 2 }
  0xaa   :  { %v221_v51 = vadd.f32 %v213_v46, %v199_v45 }
  0xab   :  { %v381_v47 = vpop.eup %380  ;;  %v367_v48 = vmul.f32 -1.442695, %v220_v41  ;;  %v200_v49 = vadd.f32 %v192_v43, %v178_v42  ;;  %v467_v41 = vmov 839922192  }
  0xac   :  { %v235_v50 = vadd.f32 1.0, %v381_v47  ;;  %v368_v57 = vmul.f32 -1.442695, %v221_v51  ;;  %v316_v42 = vunpack.c.l.s4 %v467_v41 }
  0xad   :  { %382 = vpow2.f32 %v367_v48  ;;  %v222_v56 = vadd.f32 %v214_v44, %v200_v49 }
  0xae   :  { %384 = vrcp.f32 %v235_v50  ;;  %v250_v4 = vand.u32 2147483648, %v235_v50  ;;  %v248_v6 = vand.u32 2147483647, %v235_v50  ;;  %vm244_vm4 = vweird.f32 %v235_v50 }
  0xaf   :  { %v369_v52 = vmul.f32 -1.442695, %v222_v56  ;;  %386 = vpow2.f32 %v368_v57  ;;  %v317_v43 = vunpack.c.0.s8 %v316_v42 }
  0xb0   :  { %v251_v9 = vor.u32 1.1754944e-38, %v250_v4  ;;  %vm249_vm6 = vcmp.eq.f32.partialorder %v248_v6, 8.507059e+37 }
  0xb1   :  { %388 = vpow2.f32 %v369_v52 }
  0xb3   :  { %v383_v53 = vpop.eup %382 }
  0xb4   :  { %v385_v54 = vpop.eup %384  ;;  %v236_v58 = vadd.f32 1.0, %v383_v53 }
  0xb5   :  { %v240_v55 = vmul.f32 %v385_v54, %v235_v50  ;;  %v387_v59 = vpop.eup %386  ;;  %vm245_vm3 = vweird.f32 %v385_v54 }
  0xb6   :  { %390 = vrcp.f32 %v236_v58  ;;  %v237_v61 = vadd.f32 1.0, %v387_v59  ;;  %vm246_vm5 = vmor %vm244_vm4, %vm245_vm3  ;;  %vm259_vm7 = vweird.f32 %v236_v58  ;;  %v265_v16 = vand.u32 2147483648, %v236_v58 }
  0xb7   :  { %v389_v60 = vpop.eup %388  ;;  %v241_v62 = vsub.f32 1.0, %v240_v55  ;;  %v263_v19 = vand.u32 2147483647, %v236_v58 }
  0xb8   :  { %v238_v63 = vadd.f32 1.0, %v389_v60  ;;  %392 = vrcp.f32 %v237_v61  ;;  %v280_v22 = vand.u32 2147483648, %v237_v61  ;;  %v266_v27 = vor.u32 1.1754944e-38, %v265_v16 }
  0xb9   :  { %v242_v5 = vmul.f32 %v385_v54, %v241_v62  ;;  %v278_v29 = vand.u32 2147483647, %v237_v61  ;;  %vm264_vm13 = vcmp.eq.f32.partialorder %v263_v19, 8.507059e+37  ;;  %vm274_vm14 = vweird.f32 %v237_v61 }
  0xba   :  { %394 = vrcp.f32 %v238_v63  ;;  %vm289_vm9 = vweird.f32 %v238_v63  ;;  %v295_v23 = vand.u32 2147483648, %v238_v63  ;;  %v293_v26 = vand.u32 2147483647, %v238_v63 }
  0xbb   :  { %v243_v7 = vadd.f32 %v385_v54, %v242_v5  ;;  %v281_v35 = vor.u32 1.1754944e-38, %v280_v22  ;;  %vm279_vm2 = vcmp.eq.f32.partialorder %v278_v29, 8.507059e+37 }
  0xbc   :  { %v391_v8 = vpop.eup %390  ;;  %v296_v34 = vor.u32 1.1754944e-38, %v295_v23  ;;  %vm294_vm1 = vcmp.eq.f32.partialorder %v293_v26, 8.507059e+37 }
  0xbd   :  { %v247_v10 = vsel %vm246_vm5, %v385_v54, %v243_v7  ;;  %v255_v11 = vmul.f32 %v391_v8, %v236_v58  ;;  %vm260_vm8 = vweird.f32 %v391_v8 }
  0xbe   :  { %v252_v12 = vsel %vm249_vm6, %v251_v9, %v247_v10  ;;  %v393_v13 = vpop.eup %392  ;;  %vm261_vm11 = vmor %vm259_vm7, %vm260_vm8 }
  0xbf   :  { %301 = vperm.xlu2 %377, %v252_v12   ;;  %v256_v14 = vsub.f32 1.0, %v255_v11  ;;  %v270_v17 = vmul.f32 %v393_v13, %v237_v61  ;;  %vm275_vm12 = vweird.f32 %v393_v13 }
  0xc0   :  { %v395_v15 = vpop.eup %394  ;;  %vm276_vm0 = vmor %vm274_vm14, %vm275_vm12 }
  0xc1   :  { %v257_v18 = vmul.f32 %v391_v8, %v256_v14  ;;  %v285_v20 = vmul.f32 %v395_v15, %v238_v63  ;;  %v271_v21 = vsub.f32 1.0, %v270_v17  ;;  %vm290_vm10 = vweird.f32 %v395_v15 }
  0xc2   :  { %vm291_vm15 = vmor %vm289_vm9, %vm290_vm10 }
  0xc3   :  { %v258_v24 = vadd.f32 %v391_v8, %v257_v18  ;;  %v286_v25 = vsub.f32 1.0, %v285_v20  ;;  %v272_v28 = vmul.f32 %v393_v13, %v271_v21 }
  0xc5   :  { %v262_v30 = vsel %vm261_vm11, %v391_v8, %v258_v24  ;;  %v287_v31 = vmul.f32 %v395_v15, %v286_v25  ;;  %v273_v33 = vadd.f32 %v393_v13, %v272_v28 }
  0xc6   :  { %v267_v32 = vsel %vm264_vm13, %v266_v27, %v262_v30 }
  0xc7   :  { %305 = vperm.xlu0 %378, %v267_v32   ;;  %v288_v36 = vadd.f32 %v395_v15, %v287_v31  ;;  %v277_v37 = vsel %vm276_vm0, %v393_v13, %v273_v33 }
  0xc8   :  { %v282_v38 = vsel %vm279_vm2, %v281_v35, %v277_v37 }
  0xc9   :  { %v292_v39 = vsel %vm291_vm15, %v395_v15, %v288_v36  ;;  %309 = vperm.xlu1 %379, %v282_v38  }
  0xca   :  { %v297_v40 = vsel %vm294_vm1, %v296_v34, %v292_v39 }
  0xcb   :  { %313 = vperm.xlu2 %377, %v297_v40  }
 0x119   :  { %v302_v44 = vpop.permute.xlu2 %301 }
 0x11a   :  { %v318_v45 = vperm.slane %v302_v44, %v317_v43 }
 0x11c   :  { %v335_v46 = vmul.f32 %v318_v45, %v493_v0 }
 0x11e   :  { %339 = vst [vmem:[#allocation7] sm:$0xff] %v335_v46 }
 0x125   :  { %v314_v47 = vpop.permute.xlu2 %313 }
 0x126   :  { %v330_v48 = vperm.slane %v314_v47, %v317_v43 }
 0x128   :  { %v338_v49 = vmul.f32 %v330_v48, %v500_v3 }
 0x12a   :  { %342 = vst [vmem:[#allocation7 + $0x18] sm:$0xff] %v338_v49 }
 0x139   :  { %v306_v50 = vpop.permute.xlu0 %305 }
 0x13a   :  { %v322_v51 = vperm.slane %v306_v50, %v317_v43 }
 0x13b   :  { %v310_v56 = vpop.permute.xlu1 %309 }
 0x13c   :  { %v336_v57 = vmul.f32 %v322_v51, %v497_v2  ;;  %v326_v52 = vperm.slane %v310_v56, %v317_v43 }
 0x13e   :  { %340 = vst [vmem:[#allocation7 + $0x8] sm:$0xff] %v336_v57  ;;  %v337_v0 = vmul.f32 %v326_v52, %v495_v1 }
 0x140   :  { %341 = vst [vmem:[#allocation7 + $0x10] sm:$0xff] %v337_v0 }
 0x141   :  { %355 = dma.vmem_to_hbm [thread:$0]  %s348_s23, 512, %s350_s26, [#allocation4], %s463_s17, %s463_s17, %s464_s18  }
 0x142   :  { %460 = dma.done.wait [#allocation4], 512  }
 0x143   :  { %461 = vsyncadd [#allocation4], 4294966784 }
 0x144   :  { %360 = vsyncpa [#allocation3], 1 }
 0x145   :  { %361 = vsyncpa [#allocation4], 1 }
 0x146   :  { %362 = vsyncpa [#allocation5], 1 }

</bundles_post_ra>
